<compile_context>
chip_gen: v7x
topology: tpu7x:2x2x1
jax: 0.10.0
libtpu: 0.0.40
codegen_flags: <defaults>
</compile_context>

<pallas_src>
import functools

import numpy as np
import jax
import jax.numpy as jnp
from jax import lax
from jax.experimental import pallas as pl
from jax.experimental.pallas import tpu as pltpu

_LANE = 128
_VMEM_CAP_BYTES = 64 * 1024 * 1024    # never request more than this scoped VMEM
_VMEM_SLACK_BYTES = 1 * 1024 * 1024   # headroom for Mosaic internal scratch


# ---------------------------------------------------------------------------
# helpers
# ---------------------------------------------------------------------------
def _vmem_budget_bytes():
    """Generation-aware scoped-VMEM budget (~48 MiB on v7x, 64 MiB elsewhere)."""
    cap = None
    try:
        cap = getattr(pltpu.get_tpu_info(), "vmem_capacity_bytes", None)
    except Exception:
        cap = None
    if not cap:
        cap = 64 * 1024 * 1024  # conservative default (v7x per-TC VMEM)
    return int(min((int(cap) * 3) // 4, _VMEM_CAP_BYTES))


def _choose_k_tile(hw, c, x_itemsize, fixed_bytes, vmem_budget):
    """Largest HW (contraction) tile so that two double-buffered x blocks plus
    the fixed resident buffers (target / output / accumulator) fit the budget."""
    avail = max(vmem_budget - fixed_bytes - _VMEM_SLACK_BYTES,
                2 * c * x_itemsize * _LANE)
    per_col = 2 * c * x_itemsize          # double-buffered x block, per HW column
    max_tk = avail // per_col
    if hw <= max_tk:
        return int(hw), 1                 # single full-HW block (no 128 constraint)
    tk = max(_LANE, (max_tk // _LANE) * _LANE)
    return int(tk), int(-(-hw // tk))


# ---------------------------------------------------------------------------
# Kernel builders
# ---------------------------------------------------------------------------
def _make_gram_kernel(*, inv_n, hw, tk, k_tiles, compute_dtype):
    need_mask = (hw % tk) != 0

    def body(x_ref, g_ref, acc_ref):
        k = pl.program_id(1)
        x = x_ref[0]                                        # (C, tk) block
        if need_mask:                                       # zero HW-tail lanes
            col = lax.broadcasted_iota(jnp.int32, x.shape, 1)
            x = jnp.where(col < (hw - k * tk), x, 0.0)
        x = x.astype(compute_dtype)                         # VPU cast, no HBM pass
        g = lax.dot_general(x, x,
                            dimension_numbers=(((1,), (1,)), ((), ())),
                            preferred_element_type=jnp.float32)
        if k_tiles == 1:
            g_ref[0] = (g * inv_n).astype(g_ref.dtype)
        else:
            @pl.when(k == 0)
            def _():
                acc_ref[...] = g

            @pl.when(k > 0)
            def _():
                acc_ref[...] += g

            @pl.when(k == k_tiles - 1)
            def _():
                g_ref[0] = (acc_ref[...] * inv_n).astype(g_ref.dtype)

    if k_tiles == 1:
        def kernel(x_ref, g_ref):
            body(x_ref, g_ref, None)
        return kernel
    return body


def _make_gram_loss_kernel(*, inv_n, hw, tk, k_tiles, compute_dtype):
    need_mask = (hw % tk) != 0

    def body(x_ref, t_ref, o_ref, acc_ref):
        k = pl.program_id(1)
        x = x_ref[0]
        if need_mask:
            col = lax.broadcasted_iota(jnp.int32, x.shape, 1)
            x = jnp.where(col < (hw - k * tk), x, 0.0)
        x = x.astype(compute_dtype)
        g = lax.dot_general(x, x,
                            dimension_numbers=(((1,), (1,)), ((), ())),
                            preferred_element_type=jnp.float32)
        if k_tiles == 1:
            d = g * inv_n - t_ref[0]
            o_ref[0] = jnp.sum(d * d, keepdims=True)
        else:
            @pl.when(k == 0)
            def _():
                acc_ref[...] = g

            @pl.when(k > 0)
            def _():
                acc_ref[...] += g

            @pl.when(k == k_tiles - 1)
            def _():
                d = acc_ref[...] * inv_n - t_ref[0]
                o_ref[0] = jnp.sum(d * d, keepdims=True)

    if k_tiles == 1:
        def kernel(x_ref, t_ref, o_ref):
            body(x_ref, t_ref, o_ref, None)
        return kernel
    return body


# ---------------------------------------------------------------------------
# Kernel 1: normalized Gram matrix (torch GramMatrix equivalent)
# ---------------------------------------------------------------------------
def gram_matrix(x, compute_dtype=jnp.bfloat16, k_tile_override=None):
    """x: (B, C, H, W) -> (B, C, C) normalized Gram (f32)."""
    B, C, H, W = x.shape
    hw = H * W
    xf = x.reshape(B, C, hw)                 # free reshape; no astype / pad pass
    itemsize = int(xf.dtype.itemsize)
    vmem_budget = _vmem_budget_bytes()
    fixed = 3 * C * C * 4                    # f32 acc + double-buffered f32 output
    tk, k_tiles = _choose_k_tile(hw, C, itemsize, fixed, vmem_budget)
    if k_tile_override is not None:          # testing hook (multiple of 128 or >= hw)
        tk = min(int(k_tile_override), hw)
        k_tiles = int(-(-hw // tk))
    n = float(C * hw)                        # torch x[0].numel()
    kernel = _make_gram_kernel(inv_n=1.0 / n, hw=hw, tk=tk, k_tiles=k_tiles,
                               compute_dtype=compute_dtype)
    scratch = [] if k_tiles == 1 else [pltpu.VMEM((C, C), jnp.float32)]
    return pl.pallas_call(
        kernel,
        out_shape=jax.ShapeDtypeStruct((B, C, C), jnp.float32),
        grid_spec=pltpu.PrefetchScalarGridSpec(
            num_scalar_prefetch=0,
            grid=(B, k_tiles),
            in_specs=[pl.BlockSpec((1, C, tk), lambda b, k: (b, 0, k))],
            out_specs=pl.BlockSpec((1, C, C), lambda b, k: (b, 0, 0)),
            scratch_shapes=scratch,
        ),
        compiler_params=pltpu.CompilerParams(
            dimension_semantics=("parallel", "arbitrary"),
            vmem_limit_bytes=vmem_budget),
        cost_estimate=pl.CostEstimate(
            flops=2 * B * C * C * hw,
            transcendentals=0,
            bytes_accessed=int(xf.size) * itemsize + B * C * C * 4),
    )(xf)


# ---------------------------------------------------------------------------
# Kernel 2: fused Gram(pred) + per-batch sum((Gram(pred) - target)^2)
# ---------------------------------------------------------------------------
def gram_style_loss_layer(pred, target_gram, compute_dtype=jnp.bfloat16,
                          k_tile_override=None):
    """pred: (B, C, H, W); target_gram: (B, C, C) -> scalar sum of squared diffs."""
    B, C, H, W = pred.shape
    hw = H * W
    xf = pred.reshape(B, C, hw)
    assert target_gram.shape == (B, C, C), (target_gram.shape, (B, C, C))
    tgt = target_gram.astype(jnp.float32)
    itemsize = int(xf.dtype.itemsize)
    vmem_budget = _vmem_budget_bytes()
    fixed = 3 * C * C * 4 + 64               # f32 acc + double-buffered f32 target
    tk, k_tiles = _choose_k_tile(hw, C, itemsize, fixed, vmem_budget)
    if k_tile_override is not None:
        tk = min(int(k_tile_override), hw)
        k_tiles = int(-(-hw // tk))
    n = float(C * hw)
    kernel = _make_gram_loss_kernel(inv_n=1.0 / n, hw=hw, tk=tk, k_tiles=k_tiles,
                                    compute_dtype=compute_dtype)
    scratch = [] if k_tiles == 1 else [pltpu.VMEM((C, C), jnp.float32)]
    partials = pl.pallas_call(
        kernel,
        out_shape=jax.ShapeDtypeStruct((B, 1, 1), jnp.float32),
        grid_spec=pltpu.PrefetchScalarGridSpec(
            num_scalar_prefetch=0,
            grid=(B, k_tiles),
            in_specs=[
                pl.BlockSpec((1, C, tk), lambda b, k: (b, 0, k)),
                pl.BlockSpec((1, C, C), lambda b, k: (b, 0, 0)),
            ],
            out_specs=pl.BlockSpec((1, 1, 1), lambda b, k: (b, 0, 0)),
            scratch_shapes=scratch,
        ),
        compiler_params=pltpu.CompilerParams(
            dimension_semantics=("parallel", "arbitrary"),
            vmem_limit_bytes=vmem_budget),
        cost_estimate=pl.CostEstimate(
            flops=2 * B * C * C * hw,
            transcendentals=0,
            bytes_accessed=int(xf.size) * itemsize + B * C * C * 4 + B * 4),
    )(xf, tgt)
    # Per-batch partials keep the batch grid axis "parallel"; the tiny final
    # reduction runs as a plain XLA op.
    return jnp.sum(partials)


# ---------------------------------------------------------------------------
# Module equivalent of StyleLoss_Gram (forward only)
# ---------------------------------------------------------------------------
class StyleLossGram:
    def __init__(self, targets, weights=None, compute_dtype=jnp.bfloat16,
                 k_tile_override=None):
        # compute_dtype=jnp.float32 gives a full-precision path (cheap for the
        # HBM-bound small-C layers) if bf16 Gram quantization is a concern.
        self.compute_dtype = compute_dtype
        self.k_tile_override = k_tile_override
        self.targets = [gram_matrix(t, compute_dtype, k_tile_override)
                        for t in targets]
        self.weights = [1.0] * len(targets) if weights is None else weights

    def __call__(self, preds):
        loss = jnp.float32(0.0)
        for p, t, w in zip(preds, self.targets, self.weights):
            loss = loss + gram_style_loss_layer(
                p, t, self.compute_dtype, self.k_tile_override) * w
        return loss * 0.25


# ---------------------------------------------------------------------------
# Pure-JAX reference (applies the same compute-dtype quantization)
# ---------------------------------------------------------------------------
def _gram_ref(x, compute_dtype):
    B, C, H, W = x.shape
    xf = x.reshape(B, C, H * W).astype(compute_dtype).astype(jnp.float32)
    g = jnp.einsum("bcn,bdn->bcd", xf, xf, precision=lax.Precision.HIGHEST)
    return g / (C * H * W)


def _loss_ref(preds, targets, weights, compute_dtype):
    loss = jnp.float32(0.0)
    for p, t, w in zip(preds, targets, weights):
        d = _gram_ref(p, compute_dtype) - _gram_ref(t, compute_dtype)
        loss = loss + jnp.sum(d * d) * w
    return 0.25 * loss


if __name__ == "__main__":
    key = jax.random.PRNGKey(0)
    k1, k2, k3, k4, k5, k6 = jax.random.split(key, 6)

    # Three "style layers": two nicely shaped, one with a ragged HW (16*17=272)
    # to exercise the HW-tail mask when K-tiling is forced.
    targets = [
        jax.random.normal(k1, (2, 4, 16, 16), jnp.float32),
        jax.random.normal(k2, (2, 8, 8, 8), jnp.float32),
        jax.random.normal(k3, (1, 8, 16, 17), jnp.float32),
    ]
    preds = [
        jax.random.normal(k4, (2, 4, 16, 16), jnp.float32),
        jax.random.normal(k5, (2, 8, 8, 8), jnp.float32),
        jax.random.normal(k6, (1, 8, 16, 17), jnp.float32),
    ]
    weights = [1.0, 0.5, 2.0]

    ref = _loss_ref(preds, targets, weights, jnp.bfloat16)

    # Default tiling: single full-HW block per layer at these sizes.
    loss = jax.block_until_ready(StyleLossGram(targets, weights)(preds))
    assert jnp.allclose(loss, ref, rtol=1e-3, atol=1e-6), (loss, ref)

    # Forced 128-wide K tiles: exercises the accumulator path + tail masking.
    loss_kt = jax.block_until_ready(
        StyleLossGram(targets, weights, k_tile_override=128)(preds))
    assert jnp.allclose(loss_kt, ref, rtol=1e-3, atol=1e-6), (loss_kt, ref)

    print("KERNEL_OK")
</pallas_src>

<mosaic_0001>
module attributes {stable_mosaic.version = 11 : i64} {
  func.func @kernel(%arg0: i32, %arg1: i32, %arg2: memref<1x4x256xf32, #tpu.memory_space<vmem>>, %arg3: memref<1x4x4xf32, #tpu.memory_space<vmem>>) attributes {dimension_semantics = [#tpu.dimension_semantics<parallel>, #tpu.dimension_semantics<arbitrary>], iteration_bounds = array<i64: 2, 1>, scalar_prefetch = 0 : i64, scratch_operands = 0 : i64, tpu.core_type = #tpu.core_type<tc>, window_params = [{transform_indices = @transform_0, window_bounds = array<i64: 1, 4, 256>}, {transform_indices = @transform_1, window_bounds = array<i64: 1, 4, 4>}]} {
    %c0 = arith.constant 0 : index
    %c0_0 = arith.constant 0 : index
    %c0_1 = arith.constant 0 : index
    %0 = vector.load %arg2[%c0, %c0_0, %c0_1] : memref<1x4x256xf32, #tpu.memory_space<vmem>>, vector<1x4x256xf32>
    %1 = vector.shape_cast %0 : vector<1x4x256xf32> to vector<4x256xf32>
    %2 = arith.truncf %1 : vector<4x256xf32> to vector<4x256xbf16>
    %cst = arith.constant dense<0.000000e+00> : vector<4x4xf32>
    %3 = tpu.matmul %2, %2, %cst {dimension_numbers = #tpu.dot_dimension_numbers<[1], [1], [0], [0], [0, 0, 1, 0], [], []>} : vector<4x256xbf16>, vector<4x256xbf16>, vector<4x4xf32> -> vector<4x4xf32>
    %cst_2 = arith.constant 9.765625E-4 : f32
    %4 = vector.broadcast %cst_2 : f32 to vector<4x4xf32>
    %5 = arith.mulf %3, %4 : vector<4x4xf32>
    %c0_3 = arith.constant 0 : index
    %c0_4 = arith.constant 0 : index
    %c0_5 = arith.constant 0 : index
    %6 = vector.load %arg3[%c0_3, %c0_4, %c0_5] : memref<1x4x4xf32, #tpu.memory_space<vmem>>, vector<1x4x4xf32>
    %7 = vector.shape_cast %6 : vector<1x4x4xf32> to vector<4x4xf32>
    %8 = vector.shape_cast %5 : vector<4x4xf32> to vector<1x4x4xf32>
    tpu.vector_store %arg3[%c0_3, %c0_4, %c0_5], %8 {strides = array<i32>} : memref<1x4x4xf32, #tpu.memory_space<vmem>>, vector<1x4x4xf32>,
    return
  }
  func.func @transform_0(%arg0: i32, %arg1: i32) -> (i32, i32, i32) {
    %c0_i32 = arith.constant 0 : i32
    %c0_i32_0 = arith.constant 0 : i32
    return %arg0, %c0_i32, %arg1 : i32, i32, i32
  }
  func.func @transform_1(%arg0: i32, %arg1: i32) -> (i32, i32, i32) {
    %c0_i32 = arith.constant 0 : i32
    %c0_i32_0 = arith.constant 0 : i32
    %c0_i32_1 = arith.constant 0 : i32
    return %arg0, %c0_i32, %c0_i32_0 : i32, i32, i32
  }
}

</mosaic_0001>

<bundles_post_ra>
// kernel: tpu_custom_call.1
= control target key start
LH: loop header
LB: loop body
LE: loop exit
PB: predicated region body
PF: predicated region fallthrough
CT: control target
= control target key end

     0   :  { %6 = vsyncpa [#allocation3], 0  ;;  %s669_s0 = inlined_call_operand.hbm [shape: f32[2,4,256], index: 0, kind: input, shape index: {}]   ;;  %s670_s1 = inlined_call_operand.hbm [shape: f32[2,4,4], index: 1, kind: output, shape index: {}]  }
   0x1   :  { %8 = vsyncpa [#allocation3 + $0x1], 0 }
   0x2   :  { %9 = vsyncpa [#allocation4], 0 }
   0x3   :  { %11 = vsyncpa [#allocation4 + $0x1], 0  ;;  %s496_s6 = smov 0   ;;  %s498_s7 = smov 0  }
   0x4   :  { %s500_s8 = smov 0   ;;  %s502_s9 = smov 0  }
   0x5   :  { %s504_s10 = smov 0   ;;  %s506_s11 = smov 0  }
   0x6 LB: > { %s292_s12 = sadd.s32 4294967295, %s482_s11   ;;  %s293_s13 = sadd.s32 4294967294, %s482_s11   ;;  %s482_s11 = sphi %s506_s11, %s17_s11   ;;  %s478_s10 = sphi %s504_s10, %s686_s10   ;;  %s474_s9 = sphi %s502_s9, %s685_s9   ;;  %s470_s8 = sphi %s500_s8, %s684_s8   ;;  %s466_s7 = sphi %s498_s7, %s683_s7   ;;  %s462_s6 = sphi %s496_s6, %s682_s6  }
   0x7   : > { %s29_s14 = sadd.s32 1, %s478_s10  ;;  %s38_s15 = sadd.s32 1, %s470_s8 }
   0x8   : > { %p31_p0 = scmp.ge.s32.totalorder %s29_s14, 2  ;;  %p45_p1 = scmp.ne.s32.totalorder %s470_s8, %s466_s7 }
   0x9   : > { %p46_p2 = scmp.eq.s32.totalorder %s482_s11, 0  ;;  %p51_p3 = scmp.ne.s32.totalorder %s466_s7, %s462_s6 }
   0xa   : > { %s688_s14 = smov (%p31_p0, %s29_s14), 0  ;;  %p52_p5 = scmp.eq.s32.totalorder %s292_s12, 0 }
   0xb   : > { %p537_p4 = por %p46_p2, %p45_p1  ;;  %s33_s17 = ssub.s32 %s478_s10, %s688_s14 }
   0xc   : > { %p75_p6 = scmp.eq.s32.totalorder %s292_s12, 1  ;;  %p36_p7 = scmp.eq.s32.totalorder %s33_s17, 0 }
   0xd   : > { %p543_p8 = por %p52_p5, %p51_p3  ;;  %p81_p10 = scmp.eq.s32.totalorder %s293_s13, 1 }
   0xe   : > { %p547_p9 = por %p75_p6, %p45_p1  ;;  %p319_p13 = scmp.lt.s32.totalorder %s482_s11, 2 }
   0xf   : > { %s552_s20 = scalar_select %p36_p7, %s470_s8, %s38_s15  }
  0x10   : > { %s674_s19 = scalar_select %p547_p9, 1, 0 }
  0x11   : > { %p554_p11 = por %p81_p10, %p51_p3  ;;  %s101_s22 = sand.u32 1, %s470_s8  }
  0x12   : > { %s296_s23 = sshll.u32 %s101_s22, 3  ;;  %s306_s24 = sshll.u32 %s478_s10, 7 }
  0x13   : > { %s675_s21 = scalar_select %p554_p11, 1, 0 }
  0x14   : > { %s565_s27 = scalar_lea.hbm %s669_s0, %s306_s24  ;;  %s105_s28 = scalar_lea.vmem [#allocation2], %s296_s23 }
  0x15   : > { %s115_s29 = sshll.u32 %s105_s28, 4  ;;  %p571_p0 = pnand %p319_p13, %p537_p4  ;;  %s567_s29 = int_to_ptr.vmem [resolvable:$true] %s115_s29 }
  0x16   : > { %s102_s2 = scalar_lea.sflag [#allocation3], %s101_s22  ;;  %s370_s3 = scalar_lea.hbm %s565_s27, 128 }
  0x17   : > { %p371_p3 = scmp.ne.s32.totalorder %s565_s27, %s370_s3  ;;  %p372_p5 = pneg %p571_p0 }
  0x18   : > { %s375_s12 = scalar_lea.hbm %s669_s0, 256  ;;  %p376_p4 = scmp.lt.u32.totalorder %s565_s27, %s669_s0 }
  0x19   : > { %p373_p6 = pnand %p372_p5, %p371_p3  ;;  %p377_p10 = scmp.lt.u32.totalorder %s375_s12, %s370_s3 }
  0x1a   : > { %p379_p12 = scmp.lt.u32.totalorder %s370_s3, %s565_s27 }
  0x1b   : > { %p374_p7 = pneg %p373_p6  ;;  %p378_p13 = por %p377_p10, %p376_p4 }
  0x1d   : > { %p380_p1 = por %p379_p12, %p378_p13 }
  0x1f   : > { %p381_p2 = pnand %p380_p1, %p374_p7 }
  0x21   : > { %384 = shalt.err (!%p381_p2)
}
  0x22   : > { %s385_s16 = scalar_lea.vmem %s567_s29, 128  ;;  %s484_s17 = smov [#allocation2]  }
  0x23   : > { %p386_p3 = scmp.ne.s32.totalorder %s567_s29, %s385_s16  ;;  %s390_s22 = sshll.u32 %s484_s17, 4  ;;  %s391_s22 = int_to_ptr.vmem [resolvable:$false] %s390_s22 }
  0x24   : > { %s392_s23 = scalar_lea.vmem %s391_s22, 256  ;;  %p393_p9 = scmp.lt.s32.totalorder %s567_s29, %s391_s22 }
  0x25   : > { %p388_p6 = pnand %p386_p3, %p372_p5  ;;  %p394_p4 = scmp.lt.s32.totalorder %s392_s23, %s385_s16 }
  0x27   : > { %p389_p11 = pneg %p388_p6  ;;  %p395_p10 = por %p394_p4, %p393_p9 }
  0x29   : > { %p396_p12 = pnand %p395_p10, %p389_p11 }
  0x2b   : > { %399 = shalt.err (!%p396_p12)
}
  0x2c   : > { %314 = dma.hbm_to_vmem [thread:$0]  (!%p571_p0), %s565_s27, 128, %s567_s29, %s102_s2  }
  0x2d   : > { %p677_p1 = scmp.lt.s32.totalorder %s482_s11, 3  ;;  %p678_p2 = scmp.ge.s32.totalorder %s482_s11, 1 }
  0x2f   : > { %p121_p5 = pnand %p678_p2, %p677_p1 }
  0x30   : > { %s607_s24 = sand.u32 (!%p121_p5), 1, %s466_s7  }
  0x31   : > { %124 = sbr.rel (%p121_p5) target bundleno = 298 (0x12a), region = 24  ;;  %s300_s25 = sshll.u32 (!%p121_p5), %s607_s24, 3 }
  0x32   : > { %s127_s26 = scalar_lea.sflag (!%p121_p5), [#allocation3], %s607_s24  ;;  %s130_s28 = scalar_lea.vmem (!%p121_p5), [#allocation2], %s300_s25 }
  0x38   : > { %453 = dma.done.wait (%p543_p8), %s127_s26, 128  }
  0x39   : > { %455 = vsyncadd (%p543_p8), %s127_s26, 4294967168  ;;  %v151_v0 = vld [vmem:[%s130_s28] sm:$0xff]  ;;  %s301_s27 = sshll.u32 %s607_s24, 2  ;;  %s303_s29 = sshll.u32 %s474_s9, 6  ;;  %vm198_vm0 = vcmask 27648  }
  0x3a   : > { %v153_v1 = vcombine.high %v151_v0, %v151_v0  ;;  %v155_v2 = vpack.c.bf16 %v151_v0, %v151_v0  ;;  %s148_s30 = scalar_lea.vmem [#allocation5], %s301_s27  ;;  %s620_s4 = scalar_lea.hbm %s670_s1, %s303_s29 }
  0x3b   : > { %s214_s2 = sshll.u32 %s148_s30, 4  ;;  %s201_s9 = scalar_lea.sflag [#allocation4], %s607_s24  ;;  %s622_s2 = int_to_ptr.vmem [resolvable:$true] %s214_s2 }
  0x3c   : > { %v156_v3 = vpack.c.bf16 %v153_v1, %v153_v1  ;;  %s400_s5 = scalar_lea.vmem %s622_s2, 64  ;;  %p679_p9 = scmp.ne.s32.totalorder %s674_s19, 0 }
  0x3d   : > { %p401_p8 = scmp.ne.s32.totalorder %s622_s2, %s400_s5  ;;  %s485_s12 = smov [#allocation5]  }
  0x3e   : > { %157 = vmatprep.subr.bf16.mxu0 %v156_v3  ;;  %189 = vmatprep.mubr.bf16.mxu0 %v156_v3  ;;  %s404_s13 = sshll.u32 %s485_s12, 4  ;;  %s405_s13 = int_to_ptr.vmem [resolvable:$false] %s404_s13 }
  0x3f   : > { %158 = vmatpush1.bf16.xpose.msra.mxu0 %v155_v2  ;;  %p402_p11 = pnand %p401_p8, %p679_p9  ;;  %s406_s15 = scalar_lea.vmem %s405_s13, 128 }
  0x40   : > { %p407_p7 = scmp.lt.s32.totalorder %s622_s2, %s405_s13  ;;  %p408_p13 = scmp.lt.s32.totalorder %s406_s15, %s400_s5 }
  0x41   : > { %p403_p0 = pneg %p402_p11 }
  0x42   : > { %p409_p3 = por %p408_p13, %p407_p7 }
  0x44   : > { %p410_p6 = pnand %p409_p3, %p403_p0 }
  0x46   : > { %190 = vmatmul.mubr.bf16.vlgmr.msra.gmra.mrb[0].mxu0 %v155_v2 }
 0x119   : > { %v191_v4 = vpop.f32.mrb[0].mxu0 }
 0x11a   : > { %v197_v5 = vmul.f32 0.0009765625, %v191_v4  ;;  %v193_v6 = vpop.f32.mrb[1].mxu0 }
 0x11b   : > { %v194_v7 = vpop.f32.mrb[2].mxu0 }
 0x11c   : > { %v195_v8 = vpop.f32.mrb[3].mxu0  ;;  %199 = vst.msk [vmem:[%s148_s30] sm:$0xf] %vm198_vm0, %v197_v5 }
 0x11d   : > { %413 = shalt.err (!%p410_p6)
}
 0x11e   : > { %s414_s16 = scalar_lea.hbm %s620_s4, 64  ;;  %s418_s23 = scalar_lea.hbm %s670_s1, 128 }
 0x11f   : > { %p415_p4 = scmp.ne.s32.totalorder %s620_s4, %s414_s16  ;;  %p419_p1 = scmp.lt.u32.totalorder %s620_s4, %s670_s1 }
 0x120   : > { %p420_p2 = scmp.lt.u32.totalorder %s418_s23, %s414_s16  ;;  %p422_p8 = scmp.lt.u32.totalorder %s414_s16, %s620_s4 }
 0x121   : > { %p416_p10 = pnand %p415_p4, %p679_p9 }
 0x122   : > { %p421_p5 = por %p420_p2, %p419_p1 }
 0x123   : > { %p417_p12 = pneg %p416_p10 }
 0x124   : > { %p423_p11 = por %p422_p8, %p421_p5 }
 0x126   : > { %p424_p0 = pnand %p423_p11, %p417_p12 }
 0x128   : > { %427 = shalt.err (!%p424_p0)
}
 0x129   : > { %309 = dma.vmem_to_hbm [thread:$0]  (%p679_p9), %s622_s2, 64, %s620_s4, %s201_s9  }
 0x12a PF: > { %s226_s26 = sand.u32 1, %s462_s6   ;;  %p680_p7 = scmp.ne.s32.totalorder %s675_s21, 0 }
 0x12b   : > { %p681_p13 = scmp.ge.s32.totalorder %s482_s11, 2  ;;  %s227_s28 = scalar_lea.sflag [#allocation4], %s226_s26 }
 0x12d   : > { %p316_p3 = pnand %p681_p13, %p680_p7 }
 0x12f   : > { %457 = dma.done.wait (!%p316_p3), %s227_s28, 64  }
 0x130   : > { %459 = vsyncadd (!%p316_p3), %s227_s28, 4294967232  ;;  %s17_s11 = sadd.s32 1, %s482_s11   ;;  %s682_s6 = smov %s466_s7 }
 0x131   : > { %p14_p6 = scmp.ge.s32.totalorder %s17_s11, 4   ;;  %s683_s7 = smov %s470_s8 }
 0x132   : > { %s684_s8 = smov %s552_s20  ;;  %s685_s9 = smov %s478_s10 }
 0x133   : > { %s686_s10 = smov %s688_s14  ;;  %16 = sbr.rel (!%p14_p6) target bundleno = 6 (0x6), region = 69 }
 0x13a   :  { %232 = vsyncpa [#allocation3], 1 }
 0x13b   :  { %234 = vsyncpa [#allocation3 + $0x1], 1 }
 0x13c   :  { %235 = vsyncpa [#allocation4], 1 }
 0x13d   :  { %237 = vsyncpa [#allocation4 + $0x1], 1 }

</bundles_post_ra>
